<compile_context>
chip_gen: v7x
topology: tpu7x:2x2x1
jax: 0.10.0
libtpu: 0.0.40
codegen_flags: <defaults>
</compile_context>

<pallas_src>
import functools

import numpy as np
import jax
import jax.numpy as jnp
from jax.experimental import pallas as pl
from jax.experimental.pallas import tpu as pltpu


_LANES = 128
_MAX_S_TILE = 1024          # rows of the packed S axis per block (multiple of 8)


def _vmem_limits():
    """(pipelined working-set budget, vmem_limit_bytes) derived from the chip."""
    try:
        cap = int(pltpu.get_tpu_info().vmem_capacity_bytes)
    except Exception:
        cap = 64 * 1024 * 1024          # v7x per-TC VMEM = smallest across generations
    limit = min((cap * 3) // 4, 96 * 1024 * 1024)   # 48 MiB on v7x, 96 MiB on v5e/v6e
    budget = (limit * 5) // 8                       # headroom for temporaries / spills
    return budget, limit


def _rope_kernel(x_ref, cos_ref, sina_ref, sinb_ref, o_ref, *, half):
    """Rotate one (T, Ts, P) slab.

    P = pack*D lanes hold `pack` consecutive sequence positions per row (free
    reshape of the natural (..., S, D) layout).  rotate_half is two XLU lane
    rotations (+half / -half within each D-wide segment); lanes where a roll
    crosses a segment boundary are zero-masked inside sinA / sinB, and the
    rotate_half sign is folded into sinB, so the body is pure VPU mul/add plus
    two XLU rolls (which co-issue on a separate slot).
    """
    x = x_ref[...].astype(jnp.float32)               # (T, Ts, P)
    p = x.shape[-1]
    rot_hi = pltpu.roll(x, shift=half, axis=x.ndim - 1)      # carries x1 -> 2nd half
    rot_lo = pltpu.roll(x, shift=p - half, axis=x.ndim - 1)  # carries x2 -> 1st half
    out = (x * cos_ref[...][None]
           + rot_hi * sina_ref[...][None]
           + rot_lo * sinb_ref[...][None])
    o_ref[...] = out.astype(o_ref.dtype)


@functools.lru_cache(maxsize=None)
def _rope_tables(seq_len, dim, pack):
    """cos / masked-sin tables for the lane-packed (S/pack, pack*dim) layout.

    Built once per (seq_len, dim, pack) on the host (numpy) and cached as device
    constants.  sinA multiplies roll(x, +dim/2) (valid on the 2nd half of every
    D-segment), sinB multiplies roll(x, -dim/2) and carries the rotate_half minus
    sign (valid on the 1st half); all other lanes are zero so cross-segment roll
    wrap-around never contributes.
    """
    dh = dim // 2
    inv_freq = 1.0 / (10000.0 ** (np.arange(0, dim, 2, dtype=np.float32) / dim))
    freqs = np.arange(seq_len, dtype=np.float32)[:, None] * inv_freq[None, :]  # (S, dh)
    emb = np.concatenate([freqs, freqs], axis=-1)                              # (S, D)
    cos = np.cos(emb).astype(np.float32)
    sin = np.sin(emb).astype(np.float32)
    sp, p = seq_len // pack, pack * dim
    cos_p = cos.reshape(sp, p)                       # free reshape, matches data layout
    sin_p = sin.reshape(sp, p)
    hi = (np.arange(p) % dim) >= dh                  # second half of each D-segment
    sin_a = np.where(hi[None, :], sin_p, 0.0).astype(np.float32)
    sin_b = np.where(hi[None, :], 0.0, -sin_p).astype(np.float32)
    return jnp.asarray(cos_p), jnp.asarray(sin_a), jnp.asarray(sin_b)


def _largest_divisor_leq(n, cap):
    cap = max(1, min(n, cap))
    for t in range(cap, 0, -1):
        if n % t == 0:
            return t
    return 1


def _choose_s_tile(sp):
    """Rows of the packed S axis per block: full axis if modest, else a multiple
    of 8 dividing Sp (keeps the (8,128) tiling rule and divisible grids)."""
    if sp <= _MAX_S_TILE:
        return sp
    for ts in range(_MAX_S_TILE, 0, -8):
        if sp % ts == 0:
            return ts
    return sp          # rare: no multiple-of-8 divisor; fall back to the full axis


def _choose_n_tile(n, ts, p, itemsize, budget):
    """Head-axis rows per block.  Per unit of T we account for:
       input + output blocks, double-buffered                (4 * itemsize)
       in-kernel f32 temporaries (upcast, 2 rolls, products) (~4 f32 copies)
    plus the three resident f32 tables counted double-buffered."""
    per_t = ts * p * (4 * itemsize + 4 * 4)
    tables = 3 * 2 * ts * p * 4
    avail = max(budget - tables, per_t)
    return _largest_divisor_leq(n, max(1, avail // per_t))


def _apply_rope(x):
    """Apply rotary embedding over the last dim of x: (B, H, S, D) -> same shape."""
    B, H, S, D = x.shape
    assert D % 2 == 0, "rotation dim must be even"
    dh = D // 2
    N = B * H

    # Lane-dense packing with NO data movement: fold `pack` consecutive sequence
    # positions into the lane axis (row-major reshape is free), so loads/stores
    # are full 128-lane even for small head dims.
    if D < _LANES and _LANES % D == 0 and S % (_LANES // D) == 0:
        pack = _LANES // D
    else:
        pack = 1   # TODO(synk): D not dividing 128 (e.g. 96) keeps a sub-128 lane axis.
    P = pack * D
    Sp = S // pack

    cos, sin_a, sin_b = _rope_tables(S, D, pack)
    xp = x.reshape(N, Sp, P)                          # free reshape, no transpose

    budget, limit = _vmem_limits()
    Ts = _choose_s_tile(Sp)
    T = _choose_n_tile(N, Ts, P, x.dtype.itemsize, budget)
    n_s, n_n = Sp // Ts, N // T
    if n_s * n_n == 1 and N % 2 == 0:                 # whole problem fit in one step:
        T //= 2                                       # split so v7x can use both TCs
        n_n = 2

    x_spec = pl.BlockSpec((T, Ts, P), lambda s, n: (n, s, 0))
    tbl_spec = pl.BlockSpec((Ts, P), lambda s, n: (s, 0))   # constant over inner axis

    yp = pl.pallas_call(
        functools.partial(_rope_kernel, half=dh),
        out_shape=jax.ShapeDtypeStruct((N, Sp, P), x.dtype),
        grid_spec=pltpu.PrefetchScalarGridSpec(
            num_scalar_prefetch=0,
            grid=(n_s, n_n),                          # N innermost -> table DMA reused
            in_specs=[x_spec, tbl_spec, tbl_spec, tbl_spec],
            out_specs=x_spec,
        ),
        compiler_params=pltpu.CompilerParams(
            dimension_semantics=("parallel", "parallel"),
            vmem_limit_bytes=limit,
        ),
    )(xp, cos, sin_a, sin_b)

    return yp.reshape(B, H, S, D)


def rotary_embedding_forward(q, k):
    """RotaryEmbedding.forward: q (B, Hq, S, D), k (B, Hk, S, D) -> rotated pair.

    Hq and Hk may differ (num_heads vs. group_size in LlamaSemiARHead).
    NOTE: if the surrounding model allows bf16 activations, pass q/k as bfloat16;
    the kernel upcasts to f32 internally and casts back on store, halving HBM
    traffic for this bandwidth-bound op.
    """
    return _apply_rope(q), _apply_rope(k)


def _reference(q, k):
    """Pure-JAX reference mirroring the PyTorch forward exactly."""
    _, _, S, D = q.shape
    inv_freq = 1.0 / (10000.0 ** (jnp.arange(0, D, 2, dtype=jnp.float32) / D))
    t = jnp.arange(S, dtype=jnp.float32)
    freqs = jnp.einsum("i,j->ij", t, inv_freq)
    emb = jnp.concatenate([freqs, freqs], axis=-1)
    cos = jnp.cos(emb)[None, None, :, None, :]
    sin = jnp.sin(emb)[None, None, :, None, :]

    def rotate_half(x):
        x1, x2 = jnp.split(x, 2, axis=-1)
        return jnp.concatenate([-x2, x1], axis=-1)

    def apply(x):
        x5 = x[..., None, :]
        out = x5 * cos + rotate_half(x5) * sin
        return out[..., 0, :]

    return apply(q), apply(k)


if __name__ == "__main__":
    key = jax.random.PRNGKey(0)
    kq, kk, kq2, kk2 = jax.random.split(key, 4)

    # Shapes matching LlamaSemiARHead usage: q has num_heads heads, k has
    # group_size heads; head_dim = 32 (< 128) exercises the S-packing path.
    B, Hq, Hk, S, D = 2, 8, 4, 8, 32
    q = jax.random.normal(kq, (B, Hq, S, D), dtype=jnp.float32)
    k = jax.random.normal(kk, (B, Hk, S, D), dtype=jnp.float32)

    q_rot, k_rot = rotary_embedding_forward(q, k)
    jax.block_until_ready((q_rot, k_rot))
    q_ref, k_ref = _reference(q, k)
    assert jnp.allclose(q_rot, q_ref, atol=1e-4, rtol=1e-4)
    assert jnp.allclose(k_rot, k_ref, atol=1e-4, rtol=1e-4)

    # Also exercise the D == 128 (already lane-dense, pack == 1) path.
    q2 = jax.random.normal(kq2, (1, 2, 8, 128), dtype=jnp.float32)
    k2 = jax.random.normal(kk2, (1, 2, 8, 128), dtype=jnp.float32)
    q2_rot, k2_rot = rotary_embedding_forward(q2, k2)
    jax.block_until_ready((q2_rot, k2_rot))
    q2_ref, k2_ref = _reference(q2, k2)
    assert jnp.allclose(q2_rot, q2_ref, atol=1e-4, rtol=1e-4)
    assert jnp.allclose(k2_rot, k2_ref, atol=1e-4, rtol=1e-4)

    print("KERNEL_OK")
</pallas_src>

<mosaic_0001>
module attributes {stable_mosaic.version = 11 : i64} {
  func.func @_rope_kernel(%arg0: i32, %arg1: i32, %arg2: memref<8x2x128xf32, #tpu.memory_space<vmem>>, %arg3: memref<2x128xf32, #tpu.memory_space<vmem>>, %arg4: memref<2x128xf32, #tpu.memory_space<vmem>>, %arg5: memref<2x128xf32, #tpu.memory_space<vmem>>, %arg6: memref<8x2x128xf32, #tpu.memory_space<vmem>>) attributes {dimension_semantics = [#tpu.dimension_semantics<parallel>, #tpu.dimension_semantics<parallel>], iteration_bounds = array<i64: 1, 2>, scalar_prefetch = 0 : i64, scratch_operands = 0 : i64, tpu.core_type = #tpu.core_type<tc>, window_params = [{transform_indices = @transform_0, window_bounds = array<i64: 8, 2, 128>}, {transform_indices = @transform_1, window_bounds = array<i64: 2, 128>}, {transform_indices = @transform_2, window_bounds = array<i64: 2, 128>}, {transform_indices = @transform_3, window_bounds = array<i64: 2, 128>}, {transform_indices = @transform_4, window_bounds = array<i64: 8, 2, 128>}]} {
    %c0 = arith.constant 0 : index
    %c0_0 = arith.constant 0 : index
    %c0_1 = arith.constant 0 : index
    %0 = vector.load %arg2[%c0, %c0_0, %c0_1] : memref<8x2x128xf32, #tpu.memory_space<vmem>>, vector<8x2x128xf32>
    %c16_i32 = arith.constant 16 : i32
    %1 = tpu.dynamic_rotate %0 by %c16_i32 dim 2 : vector<8x2x128xf32>, i32 -> vector<8x2x128xf32>
    %c112_i32 = arith.constant 112 : i32
    %2 = tpu.dynamic_rotate %0 by %c112_i32 dim 2 : vector<8x2x128xf32>, i32 -> vector<8x2x128xf32>
    %c0_2 = arith.constant 0 : index
    %c0_3 = arith.constant 0 : index
    %3 = vector.load %arg3[%c0_2, %c0_3] : memref<2x128xf32, #tpu.memory_space<vmem>>, vector<2x128xf32>
    %4 = vector.shape_cast %3 : vector<2x128xf32> to vector<1x2x128xf32>
    %5 = vector.broadcast %4 : vector<1x2x128xf32> to vector<8x2x128xf32>
    %6 = arith.mulf %0, %5 : vector<8x2x128xf32>
    %c0_4 = arith.constant 0 : index
    %c0_5 = arith.constant 0 : index
    %7 = vector.load %arg4[%c0_4, %c0_5] : memref<2x128xf32, #tpu.memory_space<vmem>>, vector<2x128xf32>
    %8 = vector.shape_cast %7 : vector<2x128xf32> to vector<1x2x128xf32>
    %9 = vector.broadcast %8 : vector<1x2x128xf32> to vector<8x2x128xf32>
    %10 = arith.mulf %1, %9 : vector<8x2x128xf32>
    %11 = arith.addf %6, %10 : vector<8x2x128xf32>
    %c0_6 = arith.constant 0 : index
    %c0_7 = arith.constant 0 : index
    %12 = vector.load %arg5[%c0_6, %c0_7] : memref<2x128xf32, #tpu.memory_space<vmem>>, vector<2x128xf32>
    %13 = vector.shape_cast %12 : vector<2x128xf32> to vector<1x2x128xf32>
    %14 = vector.broadcast %13 : vector<1x2x128xf32> to vector<8x2x128xf32>
    %15 = arith.mulf %2, %14 : vector<8x2x128xf32>
    %16 = arith.addf %11, %15 : vector<8x2x128xf32>
    %c0_8 = arith.constant 0 : index
    %c0_9 = arith.constant 0 : index
    %c0_10 = arith.constant 0 : index
    %17 = vector.load %arg6[%c0_8, %c0_9, %c0_10] : memref<8x2x128xf32, #tpu.memory_space<vmem>>, vector<8x2x128xf32>
    tpu.vector_store %arg6[%c0_8, %c0_9, %c0_10], %16 {strides = array<i32>} : memref<8x2x128xf32, #tpu.memory_space<vmem>>, vector<8x2x128xf32>,
    return
  }
  func.func @transform_0(%arg0: i32, %arg1: i32) -> (i32, i32, i32) {
    %c0_i32 = arith.constant 0 : i32
    %c0_i32_0 = arith.constant 0 : i32
    return %arg1, %arg0, %c0_i32 : i32, i32, i32
  }
  func.func @transform_1(%arg0: i32, %arg1: i32) -> (i32, i32) {
    %c0_i32 = arith.constant 0 : i32
    %c0_i32_0 = arith.constant 0 : i32
    return %arg0, %c0_i32 : i32, i32
  }
  func.func @transform_2(%arg0: i32, %arg1: i32) -> (i32, i32) {
    %c0_i32 = arith.constant 0 : i32
    %c0_i32_0 = arith.constant 0 : i32
    return %arg0, %c0_i32 : i32, i32
  }
  func.func @transform_3(%arg0: i32, %arg1: i32) -> (i32, i32) {
    %c0_i32 = arith.constant 0 : i32
    %c0_i32_0 = arith.constant 0 : i32
    return %arg0, %c0_i32 : i32, i32
  }
  func.func @transform_4(%arg0: i32, %arg1: i32) -> (i32, i32, i32) {
    %c0_i32 = arith.constant 0 : i32
    %c0_i32_0 = arith.constant 0 : i32
    return %arg1, %arg0, %c0_i32 : i32, i32, i32
  }
}

</mosaic_0001>

<bundles_post_ra>
// kernel: tpu_custom_call.1
= control target key start
LH: loop header
LB: loop body
LE: loop exit
PB: predicated region body
PF: predicated region fallthrough
CT: control target
= control target key end

     0   :  { %9 = vsyncpa [#allocation3], 0  ;;  %s956_s0 = inlined_call_operand.hbm [shape: f32[16,2,128], index: 0, kind: input, shape index: {}]   ;;  %s957_s1 = inlined_call_operand.vmem [shape: f32[2,128], index: 1, kind: input, shape index: {}]   ;;  %s958_s2 = inlined_call_operand.vmem [shape: f32[2,128], index: 2, kind: input, shape index: {}]   ;;  %s959_s3 = inlined_call_operand.vmem [shape: f32[2,128], index: 3, kind: input, shape index: {}]   ;;  %s960_s4 = inlined_call_operand.hbm [shape: f32[16,2,128], index: 4, kind: output, shape index: {}]  }
   0x1   :  { %11 = vsyncpa [#allocation3 + $0x1], 0 }
   0x2   :  { %12 = vsyncpa [#allocation4], 0 }
   0x3   :  { %14 = vsyncpa [#allocation4 + $0x1], 0  ;;  %s757_s15 = smov 0   ;;  %s759_s16 = smov 0  }
   0x4   :  { %s761_s17 = smov 0   ;;  %s763_s18 = smov 0  }
   0x5   :  { %s765_s19 = smov 0   ;;  %s767_s20 = smov 0  }
   0x6 LB: > { %s522_s21 = sadd.s32 4294967295, %s722_s20   ;;  %s523_s22 = sadd.s32 4294967294, %s722_s20   ;;  %s722_s20 = sphi %s767_s20, %s20_s20   ;;  %s718_s19 = sphi %s765_s19, %s975_s19   ;;  %s714_s18 = sphi %s763_s18, %s974_s18   ;;  %s710_s17 = sphi %s761_s17, %s973_s17   ;;  %s706_s16 = sphi %s759_s16, %s972_s16   ;;  %s702_s15 = sphi %s757_s15, %s971_s15  }
   0x7   : > { %s29_s23 = sadd.s32 1, %s718_s19  ;;  %s41_s24 = sadd.s32 1, %s710_s17 }
   0x8   : > { %p30_p0 = scmp.ge.s32.totalorder %s29_s23, 2  ;;  %p48_p1 = scmp.ne.s32.totalorder %s710_s17, %s706_s16 }
   0x9   : > { %p49_p2 = scmp.eq.s32.totalorder %s722_s20, 0  ;;  %p54_p3 = scmp.ne.s32.totalorder %s706_s16, %s702_s15 }
   0xa   : > { %s977_s23 = smov (%p30_p0, %s29_s23), 0  ;;  %p55_p5 = scmp.eq.s32.totalorder %s522_s21, 0 }
   0xb   : > { %p798_p4 = por %p49_p2, %p48_p1  ;;  %s36_s26 = ssub.s32 %s718_s19, %s977_s23 }
   0xc   : > { %p158_p6 = scmp.eq.s32.totalorder %s522_s21, 1  ;;  %p39_p7 = scmp.eq.s32.totalorder %s36_s26, 0 }
   0xd   : > { %p804_p8 = por %p55_p5, %p54_p3  ;;  %p164_p10 = scmp.eq.s32.totalorder %s523_s22, 1 }
   0xe   : > { %p808_p9 = por %p158_p6, %p48_p1  ;;  %p554_p13 = scmp.lt.s32.totalorder %s722_s20, 2 }
   0xf   : > { %s813_s29 = scalar_select %p39_p7, %s710_s17, %s41_s24  }
  0x10   : > { %s964_s28 = scalar_select %p808_p9, 1, 0 }
  0x11   : > { %p815_p11 = por %p164_p10, %p54_p3  ;;  %s205_s5 = sand.u32 1, %s710_s17  }
  0x12   : > { %s529_s6 = sshll.u32 %s205_s5, 4  ;;  %s540_s7 = sshll.u32 %s718_s19, 8 }
  0x13   : > { %s965_s30 = scalar_select %p815_p11, 1, 0 }
  0x14   : > { %s826_s10 = scalar_lea.hbm %s956_s0, %s540_s7  ;;  %s209_s11 = scalar_lea.vmem [#allocation2], %s529_s6 }
  0x15   : > { %s217_s12 = sshll.u32 %s209_s11, 4  ;;  %p832_p0 = pnand %p554_p13, %p798_p4  ;;  %s828_s12 = int_to_ptr.vmem [resolvable:$true] %s217_s12 }
  0x16   : > { %s837_s14 = scalar_lea.sflag [#allocation3], %s205_s5  ;;  %s610_s21 = scalar_lea.hbm %s826_s10, 256 }
  0x17   : > { %p611_p2 = scmp.ne.s32.totalorder %s826_s10, %s610_s21  ;;  %p612_p3 = pneg %p832_p0 }
  0x18   : > { %s615_s25 = scalar_lea.hbm %s956_s0, 512  ;;  %p616_p4 = scmp.lt.u32.totalorder %s826_s10, %s956_s0 }
  0x19   : > { %p613_p5 = pnand %p612_p3, %p611_p2  ;;  %p617_p7 = scmp.lt.u32.totalorder %s615_s25, %s610_s21 }
  0x1a   : > { %p619_p13 = scmp.lt.u32.totalorder %s610_s21, %s826_s10 }
  0x1b   : > { %p614_p6 = pneg %p613_p5  ;;  %p618_p10 = por %p617_p7, %p616_p4 }
  0x1d   : > { %p620_p12 = por %p619_p13, %p618_p10 }
  0x1f   : > { %p621_p1 = pnand %p620_p12, %p614_p6 }
  0x21   : > { %624 = shalt.err (!%p621_p1)
}
  0x22   : > { %s625_s5 = scalar_lea.vmem %s828_s12, 256  ;;  %s724_s7 = smov [#allocation2]  }
  0x23   : > { %p626_p2 = scmp.ne.s32.totalorder %s828_s12, %s625_s5  ;;  %s630_s8 = sshll.u32 %s724_s7, 4  ;;  %s631_s8 = int_to_ptr.vmem [resolvable:$false] %s630_s8 }
  0x24   : > { %s632_s9 = scalar_lea.vmem %s631_s8, 512  ;;  %p633_p9 = scmp.lt.s32.totalorder %s828_s12, %s631_s8 }
  0x25   : > { %p628_p5 = pnand %p626_p2, %p612_p3  ;;  %p634_p4 = scmp.lt.s32.totalorder %s632_s9, %s625_s5 }
  0x27   : > { %p629_p11 = pneg %p628_p5  ;;  %p635_p7 = por %p634_p4, %p633_p9 }
  0x29   : > { %p636_p10 = pnand %p635_p7, %p629_p11 }
  0x2b   : > { %639 = shalt.err (!%p636_p10)
}
  0x2c   : > { %s725_s11 = smov 32   ;;  %s726_s21 = smov 2  }
  0x2d   : > { %549 = dma.hbm_to_vmem [thread:$0]  (!%p832_p0), %s826_s10, 256, %s828_s12, %s837_s14, %s725_s11, %s725_s11, %s726_s21  }
  0x2e   : > { %p225_p12 = scmp.lt.s32.totalorder %s722_s20, 3  ;;  %p967_p1 = scmp.ge.s32.totalorder %s722_s20, 1 }
  0x30   : > { %p226_p3 = pnand %p967_p1, %p225_p12 }
  0x31   : > { %s869_s22 = sand.u32 (!%p226_p3), 1, %s706_s16  }
  0x32   : > { %229 = sbr.rel (%p226_p3) target bundleno = 221 (0xdd), region = 36  ;;  %s533_s24 = sshll.u32 (!%p226_p3), %s869_s22, 4 }
  0x33   : > { %s232_s25 = scalar_lea.sflag (!%p226_p3), [#allocation3], %s869_s22  ;;  %s235_s26 = scalar_lea.vmem (!%p226_p3), [#allocation2], %s533_s24 }
  0x39   : > { %693 = dma.done.wait (%p804_p8), %s232_s25, 256  }
  0x3a   : > { %695 = vsyncadd (%p804_p8), %s232_s25, 4294967040  ;;  %v288_v0 = vld [vmem:[%s235_s26 + $0x4] sm:$0x3]  ;;  %v286_v1 = vld [vmem:[%s235_s26] sm:$0x3]  ;;  %s727_s10 = smov 16  }
  0x3b   : > { %298 = vrot.lane.b32.xlu1 %v288_v0, %s727_s10  ;;  %294 = vrot.lane.b32.xlu0 %v286_v1, %s727_s10  ;;  %v289_v2 = vld [vmem:[%s235_s26 + $0x6] sm:$0x3]  ;;  %v287_v3 = vld [vmem:[%s235_s26 + $0x2] sm:$0x3]  ;;  %s728_s12 = smov 112   ;;  %s890_s8 = scalar_lea.vmem [#allocation5], %s533_s24 }
  0x3c   : > { %v291_v4 = vld [vmem:[%s235_s26 + $0xa] sm:$0x3]  ;;  %v290_v5 = vld [vmem:[%s235_s26 + $0x8] sm:$0x3]  ;;  %v293_v6 = vld [vmem:[%s235_s26 + $0xe] sm:$0x3] }
  0x3d   : > { %v292_v7 = vld [vmem:[%s235_s26 + $0xc] sm:$0x3]  ;;  %v326_v14 = vld [vmem:[%s957_s1] sm:$0x3]  ;;  %s392_s9 = sshll.u32 %s890_s8, 4  ;;  %s541_s11 = sshll.u32 %s714_s18, 8  ;;  %s898_s9 = int_to_ptr.vmem [resolvable:$true] %s392_s9 }
  0x3e   : > { %v335_v15 = vld [vmem:[%s958_s2] sm:$0x3]  ;;  %v327_v16 = vmul.f32 %v326_v14, %v286_v1  ;;  %v328_v20 = vmul.f32 %v326_v14, %v287_v3  ;;  %v329_v23 = vmul.f32 %v326_v14, %v288_v0  ;;  %v330_v24 = vmul.f32 %v326_v14, %v289_v2  ;;  %s905_s25 = scalar_lea.hbm %s960_s4, %s541_s11  ;;  %s378_s18 = scalar_lea.sflag [#allocation4], %s869_s22 }
  0x3f   : > { %300 = vrot.lane.b32.xlu1 %v289_v2, %s727_s10  ;;  %296 = vrot.lane.b32.xlu0 %v287_v3, %s727_s10  ;;  %v352_v22 = vld [vmem:[%s959_s3] sm:$0x3]  ;;  %v332_v35 = vmul.f32 %v326_v14, %v291_v4  ;;  %v331_v36 = vmul.f32 %v326_v14, %v290_v5  ;;  %v334_v47 = vmul.f32 %v326_v14, %v293_v6  ;;  %s640_s26 = scalar_lea.vmem %s898_s9, 256  ;;  %p968_p9 = scmp.ne.s32.totalorder %s964_s28, 0 }
  0x40   : > { %v333_v48 = vmul.f32 %v326_v14, %v292_v7  ;;  %p641_p8 = scmp.ne.s32.totalorder %s898_s9, %s640_s26 }
  0x42   : > { %p642_p11 = pnand %p641_p8, %p968_p9 }
  0x43   : > { %304 = vrot.lane.b32.xlu1 %v291_v4, %s727_s10  ;;  %302 = vrot.lane.b32.xlu0 %v290_v5, %s727_s10 }
  0x44   : > { %p643_p0 = pneg %p642_p11 }
  0x47   : > { %308 = vrot.lane.b32.xlu1 %v293_v6, %s727_s10  ;;  %306 = vrot.lane.b32.xlu0 %v292_v7, %s727_s10  ;;  %s729_s10 = smov [#allocation5]  }
  0x4b   : > { %312 = vrot.lane.b32.xlu1 %v287_v3, %s728_s12  ;;  %310 = vrot.lane.b32.xlu0 %v286_v1, %s728_s12 }
  0x4f   : > { %316 = vrot.lane.b32.xlu1 %v289_v2, %s728_s12  ;;  %314 = vrot.lane.b32.xlu0 %v288_v0, %s728_s12 }
  0x53   : > { %320 = vrot.lane.b32.xlu1 %v291_v4, %s728_s12  ;;  %318 = vrot.lane.b32.xlu0 %v290_v5, %s728_s12 }
  0x57   : > { %324 = vrot.lane.b32.xlu1 %v293_v6, %s728_s12  ;;  %322 = vrot.lane.b32.xlu0 %v292_v7, %s728_s12  ;;  %s644_s12 = sshll.u32 %s729_s10, 4  ;;  %s645_s12 = int_to_ptr.vmem [resolvable:$false] %s644_s12 }
  0x58   : > { %s646_s27 = scalar_lea.vmem %s645_s12, 512  ;;  %p647_p6 = scmp.lt.s32.totalorder %s898_s9, %s645_s12 }
  0x59   : > { %p648_p13 = scmp.lt.s32.totalorder %s646_s27, %s640_s26 }
  0x5b   : > { %p649_p2 = por %p648_p13, %p647_p6 }
  0x5d   : > { %p650_p5 = pnand %p649_p2, %p643_p0 }
  0xad   : > { %v299_v8 = vpop.permute.xlu1 %298  ;;  %v295_v9 = vpop.permute.xlu0 %294 }
  0xae   : > { %v336_v17 = vmul.f32 %v335_v15, %v295_v9  ;;  %v338_v25 = vmul.f32 %v335_v15, %v299_v8 }
  0xb0   : > { %v344_v26 = vadd.f32 %v336_v17, %v327_v16  ;;  %v346_v41 = vadd.f32 %v338_v25, %v329_v23 }
  0xb1   : > { %v301_v10 = vpop.permute.xlu1 %300  ;;  %v297_v11 = vpop.permute.xlu0 %296 }
  0xb2   : > { %v337_v21 = vmul.f32 %v335_v15, %v297_v11  ;;  %v339_v29 = vmul.f32 %v335_v15, %v301_v10 }
  0xb4   : > { %v345_v30 = vadd.f32 %v337_v21, %v328_v20  ;;  %v347_v42 = vadd.f32 %v339_v29, %v330_v24 }
  0xb5   : > { %v305_v12 = vpop.permute.xlu1 %304  ;;  %v303_v13 = vpop.permute.xlu0 %302 }
  0xb6   : > { %v341_v37 = vmul.f32 %v335_v15, %v305_v12  ;;  %v340_v38 = vmul.f32 %v335_v15, %v303_v13 }
  0xb8   : > { %v349_v49 = vadd.f32 %v341_v37, %v332_v35  ;;  %v348_v50 = vadd.f32 %v340_v38, %v331_v36 }
  0xb9   : > { %v309_v18 = vpop.permute.xlu1 %308  ;;  %v307_v19 = vpop.permute.xlu0 %306 }
  0xba   : > { %v343_v53 = vmul.f32 %v335_v15, %v309_v18  ;;  %v342_v54 = vmul.f32 %v335_v15, %v307_v19 }
  0xbc   : > { %v351_v61 = vadd.f32 %v343_v53, %v334_v47  ;;  %v350_v62 = vadd.f32 %v342_v54, %v333_v48 }
  0xbd   : > { %v313_v27 = vpop.permute.xlu1 %312  ;;  %v311_v28 = vpop.permute.xlu0 %310 }
  0xbe   : > { %v354_v31 = vmul.f32 %v352_v22, %v313_v27  ;;  %v353_v32 = vmul.f32 %v352_v22, %v311_v28 }
  0xc0   : > { %v362_v33 = vadd.f32 %v354_v31, %v345_v30  ;;  %v361_v34 = vadd.f32 %v353_v32, %v344_v26 }
  0xc1   : > { %v317_v39 = vpop.permute.xlu1 %316  ;;  %v315_v40 = vpop.permute.xlu0 %314 }
  0xc2   : > { %370 = vst [vmem:[%s890_s8 + $0x2] sm:$0x3] %v362_v33  ;;  %369 = vst [vmem:[%s890_s8] sm:$0x3] %v361_v34  ;;  %v356_v43 = vmul.f32 %v352_v22, %v317_v39  ;;  %v355_v44 = vmul.f32 %v352_v22, %v315_v40 }
  0xc4   : > { %v364_v45 = vadd.f32 %v356_v43, %v347_v42  ;;  %v363_v46 = vadd.f32 %v355_v44, %v346_v41 }
  0xc5   : > { %v321_v51 = vpop.permute.xlu1 %320  ;;  %v319_v52 = vpop.permute.xlu0 %318 }
  0xc6   : > { %372 = vst [vmem:[%s890_s8 + $0x6] sm:$0x3] %v364_v45  ;;  %371 = vst [vmem:[%s890_s8 + $0x4] sm:$0x3] %v363_v46  ;;  %v358_v55 = vmul.f32 %v352_v22, %v321_v51  ;;  %v357_v56 = vmul.f32 %v352_v22, %v319_v52 }
  0xc8   : > { %v366_v57 = vadd.f32 %v358_v55, %v349_v49  ;;  %v365_v58 = vadd.f32 %v357_v56, %v348_v50 }
  0xc9   : > { %v325_v59 = vpop.permute.xlu1 %324  ;;  %v323_v60 = vpop.permute.xlu0 %322 }
  0xca   : > { %374 = vst [vmem:[%s890_s8 + $0xa] sm:$0x3] %v366_v57  ;;  %373 = vst [vmem:[%s890_s8 + $0x8] sm:$0x3] %v365_v58  ;;  %v360_v63 = vmul.f32 %v352_v22, %v325_v59  ;;  %v359_v0 = vmul.f32 %v352_v22, %v323_v60 }
  0xcc   : > { %v368_v1 = vadd.f32 %v360_v63, %v351_v61  ;;  %v367_v2 = vadd.f32 %v359_v0, %v350_v62 }
  0xce   : > { %376 = vst [vmem:[%s890_s8 + $0xe] sm:$0x3] %v368_v1  ;;  %375 = vst [vmem:[%s890_s8 + $0xc] sm:$0x3] %v367_v2 }
  0xcf   : > { %653 = shalt.err (!%p650_p5)
}
  0xd0   : > { %s654_s13 = scalar_lea.hbm %s905_s25, 256  ;;  %s658_s5 = scalar_lea.hbm %s960_s4, 512 }
  0xd1   : > { %p655_p4 = scmp.ne.s32.totalorder %s905_s25, %s654_s13  ;;  %p659_p12 = scmp.lt.u32.totalorder %s905_s25, %s960_s4 }
  0xd2   : > { %p660_p1 = scmp.lt.u32.totalorder %s658_s5, %s654_s13  ;;  %p662_p8 = scmp.lt.u32.totalorder %s654_s13, %s905_s25 }
  0xd3   : > { %p656_p7 = pnand %p655_p4, %p968_p9 }
  0xd4   : > { %p661_p3 = por %p660_p1, %p659_p12 }
  0xd5   : > { %p657_p10 = pneg %p656_p7 }
  0xd6   : > { %p663_p11 = por %p662_p8, %p661_p3 }
  0xd8   : > { %p664_p0 = pnand %p663_p11, %p657_p10 }
  0xda   : > { %667 = shalt.err (!%p664_p0)
}
  0xdb   : > { %s730_s11 = smov 32   ;;  %s731_s21 = smov 2  }
  0xdc   : > { %544 = dma.vmem_to_hbm [thread:$0]  (%p968_p9), %s898_s9, 256, %s905_s25, %s378_s18, %s730_s11, %s730_s11, %s731_s21  }
  0xdd PF: > { %s407_s24 = sand.u32 1, %s702_s15   ;;  %p969_p6 = scmp.ne.s32.totalorder %s965_s30, 0 }
  0xde   : > { %p970_p13 = scmp.ge.s32.totalorder %s722_s20, 2  ;;  %s408_s26 = scalar_lea.sflag [#allocation4], %s407_s24 }
  0xe0   : > { %p551_p2 = pnand %p970_p13, %p969_p6 }
  0xe2   : > { %697 = dma.done.wait (!%p551_p2), %s408_s26, 256  }
  0xe3   : > { %699 = vsyncadd (!%p551_p2), %s408_s26, 4294967040  ;;  %s20_s20 = sadd.s32 1, %s722_s20   ;;  %s971_s15 = smov %s706_s16 }
  0xe4   : > { %p17_p5 = scmp.ge.s32.totalorder %s20_s20, 4   ;;  %s972_s16 = smov %s710_s17 }
  0xe5   : > { %s973_s17 = smov %s813_s29  ;;  %s974_s18 = smov %s718_s19 }
  0xe6   : > { %s975_s19 = smov %s977_s23  ;;  %19 = sbr.rel (!%p17_p5) target bundleno = 6 (0x6), region = 90 }
  0xed   :  { %413 = vsyncpa [#allocation3], 1 }
  0xee   :  { %415 = vsyncpa [#allocation3 + $0x1], 1 }
  0xef   :  { %416 = vsyncpa [#allocation4], 1 }
  0xf0   :  { %418 = vsyncpa [#allocation4 + $0x1], 1 }

</bundles_post_ra>
